<compile_context>
chip_gen: v5e
topology: v5e:2x2
jax: 0.10.0
libtpu: 0.0.40
codegen_flags: <defaults>
</compile_context>

<pallas_src>
import functools

import jax
import jax.numpy as jnp
import numpy as np
from jax.experimental import pallas as pl
from jax.experimental.pallas import tpu as pltpu


def _round_up(a, m):
    return (a + m - 1) // m * m


def _vmem_cap_bytes():
    """Physical VMEM per TensorCore (64 MiB on v7x, 128 MiB on v5e/v6e)."""
    try:
        return int(pltpu.get_tpu_info().vmem_capacity_bytes)
    except Exception:
        return 64 << 20  # conservative fallback (v7x)


def _crosscoder_kernel(
    # inputs (one block per grid step)
    x_ref,      # (TB, LDp)  f32
    we_ref,     # (LDp, TH)  f32 / bf16
    wd_ref,     # (TH, LDp)  f32 / bf16
    bn_ref,     # (2,  TH)   f32   row 0 = b_enc, row 1 = total decoder norm
    bd_ref,     # (1,  LDp)  f32   (resident: constant block index)
    # outputs
    recon_ref,  # (TB, LDp)  f32   resident across h -> used as the accumulator
    acts_ref,   # (TB, TH)   f32
    l2p_ref,    # (TB, 128)  f32   per-row L2 partial (lane-broadcast)
    l1p_ref,    # (TB, 128)  f32   per-row L1 partial (lane-broadcast)
    # scratch
    l1acc_ref,  # (TB, 1)    f32   per-row L1 accumulator over hidden tiles
    *maybe_xcast,              # optional (TB, LDp) bf16: hoisted cast of x
    nh: int,
    cast_x: bool,
):
    h = pl.program_id(1)
    single = (nh == 1)

    # ---- LHS for the encode matmul ----
    if cast_x:
        xcast_ref = maybe_xcast[0]

        @pl.when(h == 0)
        def _cast():
            xcast_ref[...] = x_ref[...].astype(xcast_ref.dtype)

        x_mat = xcast_ref[...]
    else:
        x_mat = x_ref[...]
        if x_mat.dtype != we_ref.dtype:
            x_mat = x_mat.astype(we_ref.dtype)

    be = bn_ref[0:1, :]    # (1, TH)
    nrm = bn_ref[1:2, :]   # (1, TH)

    # ---- encode for this hidden tile: relu(x @ W_enc + b_enc) ----
    x_enc = jnp.dot(x_mat, we_ref[...], preferred_element_type=jnp.float32)
    acts = jnp.maximum(x_enc + be, 0.0)            # (TB, TH) f32
    acts_ref[...] = acts

    # ---- decode partial (MXU) ----
    dec = jnp.dot(acts.astype(wd_ref.dtype), wd_ref[...],
                  preferred_element_type=jnp.float32)   # (TB, LDp)

    # ---- L1 partial: VPU multiply + lane reduce (no extra MXU pass) ----
    l1row = jnp.sum(acts * nrm, axis=-1, keepdims=True)    # (TB, 1)

    if single:
        # Weights-resident path (nh == 1): no accumulation machinery at all.
        recon = dec + bd_ref[...]
        recon_ref[...] = recon
        diff = recon - x_ref[...]
        l2row = jnp.sum(diff * diff, axis=-1, keepdims=True)
        l2p_ref[...] = jnp.broadcast_to(l2row, l2p_ref.shape)
        l1p_ref[...] = jnp.broadcast_to(l1row, l1p_ref.shape)
    else:
        @pl.when(h == 0)
        def _init():
            recon_ref[...] = jnp.zeros_like(recon_ref)
            l1acc_ref[...] = jnp.zeros_like(l1acc_ref)

        recon_ref[...] += dec           # accumulate directly in the resident output
        l1acc_ref[...] += l1row

        @pl.when(h == nh - 1)
        def _finalize():
            recon = recon_ref[...] + bd_ref[...]
            recon_ref[...] = recon
            diff = recon - x_ref[...]
            l2row = jnp.sum(diff * diff, axis=-1, keepdims=True)
            l2p_ref[...] = jnp.broadcast_to(l2row, l2p_ref.shape)
            l1p_ref[...] = jnp.broadcast_to(l1acc_ref[...], l1p_ref.shape)


def crosscoder_forward(x, W_enc, b_enc, W_dec, b_dec, l1_coeff=0.0003, *,
                       tb=None, th=None, use_bf16_matmul=False):
    """Pallas implementation of CrossCoderAdapter.forward.

    x: [B, L, D]   W_enc: [L, D, H]   b_enc: [H]   W_dec: [H, L, D]   b_dec: [L, D]
    Returns (loss, x_reconstruct, acts, l2_loss, l1_loss), matching PyTorch.

    use_bf16_matmul=True streams the weights in bf16 (recommended on v6e/v7x
    for large configs; recon/acts then carry bf16-matmul precision).
    """
    B, L, D = x.shape
    H = W_enc.shape[-1]
    LD = L * D
    f32 = jnp.float32

    # ---- per-generation VMEM budget ----
    cap = _vmem_cap_bytes()
    small_vmem = cap < (96 << 20)                       # v7x-class part
    vmem_limit = int(min(cap - (8 << 20), 100 << 20))   # headroom on every gen
    budget = int(vmem_limit * 0.85)                      # block-allocation budget

    w_dtype = jnp.bfloat16 if use_bf16_matmul else f32
    w_bytes = 2 if use_bf16_matmul else 4

    LDp = _round_up(LD, 128)
    Hp128 = _round_up(H, 128)

    # ---- hidden-tile selection (weights-resident fast path when they fit) ----
    auto_th = th is None
    if auto_th:
        resident_bytes = 2 * 2 * LDp * Hp128 * w_bytes   # 2 weights x 2 buffers
        if resident_bytes <= budget // 2:
            th = Hp128                                   # nh == 1: weights DMA'd once
        else:
            th = ((budget * 2 // 5) // (4 * LDp * w_bytes)) // 128 * 128
            th = max(128, min(th, 2048, Hp128))
    else:
        th = max(128, _round_up(int(th), 128))
        th = min(th, Hp128)

    # ---- batch-tile selection (primary arithmetic-intensity knob) ----
    auto_tb = tb is None
    if auto_tb:
        tb = min(512, _round_up(B, 8))
        if small_vmem and B >= 16:
            # keep nb >= 2 so both v7x TensorCores get work on the parallel axis
            tb = min(tb, _round_up((B + 1) // 2, 8))
    tb = max(8, _round_up(int(tb), 8))

    # ---- scale tiles down if the (untiled-LD) blocks blow the VMEM budget ----
    def _est(tb_, th_):
        b = 0
        b += 2 * tb_ * LDp * 4            # x blocks (double-buffered)
        b += 2 * tb_ * LDp * 4            # recon blocks
        b += 2 * tb_ * th_ * 4            # acts blocks
        b += 2 * LDp * th_ * w_bytes      # W_enc blocks
        b += 2 * th_ * LDp * w_bytes      # W_dec blocks
        b += 2 * 8 * th_ * 4              # b_enc + norm (sublane-padded)
        b += 2 * 8 * LDp * 4              # b_dec
        b += 2 * 2 * tb_ * 128 * 4        # L2/L1 partials
        b += tb_ * 128 * 4                # l1 accumulator scratch
        if use_bf16_matmul:
            b += tb_ * LDp * 2            # hoisted bf16 x copy
        return b

    if auto_tb or auto_th:
        while _est(tb, th) > budget and (tb > 8 or th > 128):
            x_side = tb * LDp * (10 if use_bf16_matmul else 8)
            w_side = 4 * LDp * th * w_bytes
            if ((w_side >= x_side and th > 128) or tb <= 8) and auto_th:
                th = max(128, _round_up(th // 2, 128))
            elif tb > 8 and auto_tb:
                tb = max(8, _round_up(tb // 2, 8))
            else:
                break

    H_pad = _round_up(H, th)
    B_pad = _round_up(B, tb)
    nb, nh = B_pad // tb, H_pad // th
    cast_x = use_bf16_matmul and nh > 1

    # ---- flatten to 2-D (lane-dense) + zero-pad ----
    def pad2(a, r, c):
        pr, pc = r - a.shape[0], c - a.shape[1]
        return a if (pr == 0 and pc == 0) else jnp.pad(a, ((0, pr), (0, pc)))

    x_p = pad2(x.reshape(B, LD).astype(f32), B_pad, LDp)
    we_p = pad2(W_enc.reshape(LD, H).astype(f32), LDp, H_pad).astype(w_dtype)
    wd_p = pad2(W_dec.reshape(H, LD).astype(f32), H_pad, LDp).astype(w_dtype)
    bd_p = pad2(b_dec.reshape(1, LD).astype(f32), 1, LDp)

    # total decoder norm depends only on W_dec -> hoisted out of the kernel and
    # packed with b_enc into one (2, H_pad) array (single tiny DMA stream).
    total_norm = jnp.sum(jnp.sqrt(jnp.sum(W_dec.astype(f32) ** 2, axis=-1)),
                         axis=-1)                                    # (H,)
    bn_p = pad2(jnp.stack([b_enc.astype(f32), total_norm], axis=0), 2, H_pad)

    kernel = functools.partial(_crosscoder_kernel, nh=nh, cast_x=cast_x)

    out_shapes = (
        jax.ShapeDtypeStruct((B_pad, LDp), f32),     # x_reconstruct (flat, padded)
        jax.ShapeDtypeStruct((B_pad, H_pad), f32),   # acts (padded)
        jax.ShapeDtypeStruct((B_pad, 128), f32),     # per-row L2 partials
        jax.ShapeDtypeStruct((B_pad, 128), f32),     # per-row L1 partials
    )

    scratch_shapes = [pltpu.VMEM((tb, 1), f32)]      # per-row L1 accumulator
    if cast_x:
        scratch_shapes.append(pltpu.VMEM((tb, LDp), w_dtype))

    grid_spec = pltpu.PrefetchScalarGridSpec(
        num_scalar_prefetch=0,
        grid=(nb, nh),
        in_specs=[
            pl.BlockSpec((tb, LDp), lambda b, h: (b, 0)),    # x (resident across h)
            pl.BlockSpec((LDp, th), lambda b, h: (0, h)),    # W_enc
            pl.BlockSpec((th, LDp), lambda b, h: (h, 0)),    # W_dec
            pl.BlockSpec((2, th), lambda b, h: (0, h)),      # b_enc + decoder norm
            pl.BlockSpec((1, LDp), lambda b, h: (0, 0)),     # b_dec (resident)
        ],
        out_specs=(
            pl.BlockSpec((tb, LDp), lambda b, h: (b, 0)),    # recon (accumulator)
            pl.BlockSpec((tb, th), lambda b, h: (b, h)),     # acts
            pl.BlockSpec((tb, 128), lambda b, h: (b, 0)),    # L2 partials
            pl.BlockSpec((tb, 128), lambda b, h: (b, 0)),    # L1 partials
        ),
        scratch_shapes=scratch_shapes,
    )

    weight_stream = (1 if nh == 1 else nb) * 2 * LDp * H_pad * w_bytes
    cost = pl.CostEstimate(
        flops=int(4 * B_pad * LDp * H_pad),
        transcendentals=0,
        bytes_accessed=int(weight_stream + 2 * B_pad * LDp * 4
                           + B_pad * H_pad * 4 + 2 * B_pad * 128 * 4),
    )

    recon_p, acts_p, l2p, l1p = pl.pallas_call(
        kernel,
        out_shape=out_shapes,
        grid_spec=grid_spec,
        compiler_params=pltpu.CompilerParams(
            dimension_semantics=("parallel", "arbitrary"),
            vmem_limit_bytes=vmem_limit,
        ),
        cost_estimate=cost,
    )(x_p, we_p, wd_p, bn_p, bd_p)

    # Padded batch rows produce garbage partials (no in-kernel masking anymore):
    # slice to [:B] before reducing.
    x_reconstruct = recon_p[:B, :LD].reshape(B, L, D)
    acts = acts_p[:B, :H]
    l2_loss = jnp.sum(l2p[:B, 0]) / B
    l1_loss = jnp.sum(l1p[:B, 0]) / B
    loss = l2_loss + l1_loss * jnp.float32(l1_coeff)
    return loss, x_reconstruct, acts, l2_loss, l1_loss


def _reference_forward(x, W_enc, b_enc, W_dec, b_dec, l1_coeff=0.0003):
    """Pure-JAX port of the PyTorch forward, for verification."""
    x_enc = jnp.einsum('bld,ldh->bh', x, W_enc)
    acts = jax.nn.relu(x_enc + b_enc)
    x_reconstruct = jnp.einsum('bh,hld->bld', acts, W_dec) + b_dec
    diff = x_reconstruct - x
    l2_loss = jnp.mean(jnp.sum(diff ** 2, axis=(1, 2)))
    decoder_norms = jnp.linalg.norm(W_dec, axis=-1)            # [H, L]
    total_decoder_norm = jnp.sum(decoder_norms, axis=-1)       # [H]
    l1_loss = jnp.mean(jnp.sum(acts * total_decoder_norm[None, :], axis=-1))
    loss = l2_loss + l1_loss * l1_coeff
    return loss, x_reconstruct, acts, l2_loss, l1_loss


def _check(out, ref, rtol, atol):
    for name, o, r in zip(("loss", "recon", "acts", "l2", "l1"), out, ref):
        np.testing.assert_allclose(np.asarray(o), np.asarray(r),
                                   rtol=rtol, atol=atol, err_msg=name)


# TODO(synk): host-side adapter plumbing (state-dict loading, .to(), grad
# projection) has no kernel-side equivalent; only forward() is implemented.

if __name__ == "__main__":
    # [batch, n_layers, d_model] input, hidden dim H.  B=20 deliberately not a
    # multiple of the batch tile so the padded-row path is exercised.
    B, L, D, H = 20, 2, 128, 384
    l1_coeff = 0.0003

    key = jax.random.PRNGKey(0)
    kx, kwe, kbe, kwd, kbd = jax.random.split(key, 5)
    x = jax.random.normal(kx, (B, L, D), dtype=jnp.float32)
    W_enc = jax.random.normal(kwe, (L, D, H), dtype=jnp.float32) * 0.05
    b_enc = jax.random.normal(kbe, (H,), dtype=jnp.float32) * 0.01
    W_dec = jax.random.normal(kwd, (H, L, D), dtype=jnp.float32) * 0.05
    b_dec = jax.random.normal(kbd, (L, D), dtype=jnp.float32) * 0.01

    ref = jax.block_until_ready(
        _reference_forward(x, W_enc, b_enc, W_dec, b_dec, l1_coeff))

    # (1) small explicit tiles: multi batch-tile (padded tail) x 3 hidden tiles
    #     -> exercises the recon-resident accumulator, init/finalize and the
    #     blocked bias/norm stream.
    out = jax.block_until_ready(
        crosscoder_forward(x, W_enc, b_enc, W_dec, b_dec, l1_coeff, tb=8, th=128))
    _check(out, ref, rtol=2e-4, atol=2e-4)

    # (2) default auto-tiling path (weights-resident nh==1 fast path here).
    out2 = jax.block_until_ready(
        crosscoder_forward(x, W_enc, b_enc, W_dec, b_dec, l1_coeff))
    _check(out2, ref, rtol=2e-4, atol=2e-4)

    # (3) bf16 weight-streaming fast path (hoisted x cast); loose tolerance on
    #     the scalar losses (recon/acts carry bf16-matmul precision).
    out3 = jax.block_until_ready(
        crosscoder_forward(x, W_enc, b_enc, W_dec, b_dec, l1_coeff,
                           tb=8, th=128, use_bf16_matmul=True))
    for i in (0, 3, 4):  # loss, l2, l1
        np.testing.assert_allclose(np.asarray(out3[i]), np.asarray(ref[i]),
                                   rtol=5e-2, atol=5e-2)

    print("KERNEL_OK")
</pallas_src>

<mosaic_0001>
module attributes {stable_mosaic.version = 11 : i64} {
  func.func @_crosscoder_kernel(%arg0: i32, %arg1: i32, %arg2: memref<8x256xf32, #tpu.memory_space<vmem>>, %arg3: memref<256x128xf32, #tpu.memory_space<vmem>>, %arg4: memref<128x256xf32, #tpu.memory_space<vmem>>, %arg5: memref<2x128xf32, #tpu.memory_space<vmem>>, %arg6: memref<1x256xf32, #tpu.memory_space<vmem>>, %arg7: memref<8x256xf32, #tpu.memory_space<vmem>>, %arg8: memref<8x128xf32, #tpu.memory_space<vmem>>, %arg9: memref<8x128xf32, #tpu.memory_space<vmem>>, %arg10: memref<8x128xf32, #tpu.memory_space<vmem>>, %arg11: memref<8x1xf32, #tpu.memory_space<vmem>>) attributes {dimension_semantics = [#tpu.dimension_semantics<parallel>, #tpu.dimension_semantics<arbitrary>], iteration_bounds = array<i64: 3, 3>, scalar_prefetch = 0 : i64, scratch_operands = 1 : i64, tpu.core_type = #tpu.core_type<tc>, window_params = [{transform_indices = @transform_0, window_bounds = array<i64: 8, 256>}, {transform_indices = @transform_1, window_bounds = array<i64: 256, 128>}, {transform_indices = @transform_2, window_bounds = array<i64: 128, 256>}, {transform_indices = @transform_3, window_bounds = array<i64: 2, 128>}, {pipeline_mode = #tpu.pipeline_mode<synchronous>, transform_indices = @transform_4, window_bounds = array<i64: 1, 256>}, {transform_indices = @transform_5, window_bounds = array<i64: 8, 256>}, {transform_indices = @transform_6, window_bounds = array<i64: 8, 128>}, {transform_indices = @transform_7, window_bounds = array<i64: 8, 128>}, {transform_indices = @transform_8, window_bounds = array<i64: 8, 128>}]} {
    %c0 = arith.constant 0 : index
    %c0_0 = arith.constant 0 : index
    %0 = vector.load %arg2[%c0, %c0_0] : memref<8x256xf32, #tpu.memory_space<vmem>>, vector<8x256xf32>
    %c0_1 = arith.constant 0 : index
    %c0_2 = arith.constant 0 : index
    %1 = vector.load %arg5[%c0_1, %c0_2] : memref<2x128xf32, #tpu.memory_space<vmem>>, vector<1x128xf32>
    %c1 = arith.constant 1 : index
    %c0_3 = arith.constant 0 : index
    %2 = vector.load %arg5[%c1, %c0_3] : memref<2x128xf32, #tpu.memory_space<vmem>>, vector<1x128xf32>
    %c0_4 = arith.constant 0 : index
    %c0_5 = arith.constant 0 : index
    %3 = vector.load %arg3[%c0_4, %c0_5] : memref<256x128xf32, #tpu.memory_space<vmem>>, vector<256x128xf32>
    %cst = arith.constant dense<0.000000e+00> : vector<8x128xf32>
    %4 = tpu.matmul %0, %3, %cst {dimension_numbers = #tpu.dot_dimension_numbers<[1], [0], [0], [1], [0, 0, 1, 1], [], []>} : vector<8x256xf32>, vector<256x128xf32>, vector<8x128xf32> -> vector<8x128xf32>
    %5 = vector.broadcast %1 : vector<1x128xf32> to vector<8x128xf32>
    %6 = arith.addf %4, %5 : vector<8x128xf32>
    %cst_6 = arith.constant 0.000000e+00 : f32
    %7 = vector.broadcast %cst_6 : f32 to vector<8x128xf32>
    %8 = arith.maximumf %6, %7 : vector<8x128xf32>
    %c0_7 = arith.constant 0 : index
    %c0_8 = arith.constant 0 : index
    %9 = vector.load %arg8[%c0_7, %c0_8] : memref<8x128xf32, #tpu.memory_space<vmem>>, vector<8x128xf32>
    tpu.vector_store %arg8[%c0_7, %c0_8], %8 {strides = array<i32>} : memref<8x128xf32, #tpu.memory_space<vmem>>, vector<8x128xf32>,
    %c0_9 = arith.constant 0 : index
    %c0_10 = arith.constant 0 : index
    %10 = vector.load %arg4[%c0_9, %c0_10] : memref<128x256xf32, #tpu.memory_space<vmem>>, vector<128x256xf32>
    %cst_11 = arith.constant dense<0.000000e+00> : vector<8x256xf32>
    %11 = tpu.matmul %8, %10, %cst_11 {dimension_numbers = #tpu.dot_dimension_numbers<[1], [0], [0], [1], [0, 0, 1, 1], [], []>} : vector<8x128xf32>, vector<128x256xf32>, vector<8x256xf32> -> vector<8x256xf32>
    %12 = vector.broadcast %2 : vector<1x128xf32> to vector<8x128xf32>
    %13 = arith.mulf %8, %12 : vector<8x128xf32>
    %cst_12 = arith.constant dense<0.000000e+00> : vector<8xf32>
    %14 = vector.multi_reduction <add>, %13, %cst_12 [1] : vector<8x128xf32> to vector<8xf32>
    %15 = vector.shape_cast %14 : vector<8xf32> to vector<8x1xf32>
    %c0_i32 = arith.constant 0 : i32
    %16 = arith.cmpi eq, %arg1, %c0_i32 : i32
    %17 = arith.extui %16 : i1 to i32
    %c0_i32_13 = arith.constant 0 : i32
    %18 = arith.cmpi ne, %17, %c0_i32_13 : i32
    scf.if %18 {
      %cst_23 = arith.constant 0.000000e+00 : f32
      %28 = vector.broadcast %cst_23 : f32 to vector<8x256xf32>
      %c0_24 = arith.constant 0 : index
      %c0_25 = arith.constant 0 : index
      %29 = vector.load %arg7[%c0_24, %c0_25] : memref<8x256xf32, #tpu.memory_space<vmem>>, vector<8x256xf32>
      tpu.vector_store %arg7[%c0_24, %c0_25], %28 {strides = array<i32>} : memref<8x256xf32, #tpu.memory_space<vmem>>, vector<8x256xf32>,
      %cst_26 = arith.constant 0.000000e+00 : f32
      %30 = vector.broadcast %cst_26 : f32 to vector<8x1xf32>
      %c0_27 = arith.constant 0 : index
      %c0_28 = arith.constant 0 : index
      %31 = vector.load %arg11[%c0_27, %c0_28] : memref<8x1xf32, #tpu.memory_space<vmem>>, vector<8x1xf32>
      tpu.vector_store %arg11[%c0_27, %c0_28], %30 {strides = array<i32>} : memref<8x1xf32, #tpu.memory_space<vmem>>, vector<8x1xf32>,
    } else {
    }
    %c0_14 = arith.constant 0 : index
    %c0_15 = arith.constant 0 : index
    %19 = vector.load %arg7[%c0_14, %c0_15] : memref<8x256xf32, #tpu.memory_space<vmem>>, vector<8x256xf32>
    %20 = arith.addf %19, %11 : vector<8x256xf32>
    %c0_16 = arith.constant 0 : index
    %c0_17 = arith.constant 0 : index
    %21 = vector.load %arg7[%c0_16, %c0_17] : memref<8x256xf32, #tpu.memory_space<vmem>>, vector<8x256xf32>
    tpu.vector_store %arg7[%c0_16, %c0_17], %20 {strides = array<i32>} : memref<8x256xf32, #tpu.memory_space<vmem>>, vector<8x256xf32>,
    %c0_18 = arith.constant 0 : index
    %c0_19 = arith.constant 0 : index
    %22 = vector.load %arg11[%c0_18, %c0_19] : memref<8x1xf32, #tpu.memory_space<vmem>>, vector<8x1xf32>
    %23 = arith.addf %22, %15 : vector<8x1xf32>
    %c0_20 = arith.constant 0 : index
    %c0_21 = arith.constant 0 : index
    %24 = vector.load %arg11[%c0_20, %c0_21] : memref<8x1xf32, #tpu.memory_space<vmem>>, vector<8x1xf32>
    tpu.vector_store %arg11[%c0_20, %c0_21], %23 {strides = array<i32>} : memref<8x1xf32, #tpu.memory_space<vmem>>, vector<8x1xf32>,
    %c2_i32 = arith.constant 2 : i32
    %25 = arith.cmpi eq, %arg1, %c2_i32 : i32
    %26 = arith.extui %25 : i1 to i32
    %c0_i32_22 = arith.constant 0 : i32
    %27 = arith.cmpi ne, %26, %c0_i32_22 : i32
    scf.if %27 {
      %c0_23 = arith.constant 0 : index
      %c0_24 = arith.constant 0 : index
      %28 = vector.load %arg7[%c0_23, %c0_24] : memref<8x256xf32, #tpu.memory_space<vmem>>, vector<8x256xf32>
      %c0_25 = arith.constant 0 : index
      %c0_26 = arith.constant 0 : index
      %29 = vector.load %arg6[%c0_25, %c0_26] : memref<1x256xf32, #tpu.memory_space<vmem>>, vector<1x256xf32>
      %30 = vector.broadcast %29 : vector<1x256xf32> to vector<8x256xf32>
      %31 = arith.addf %28, %30 : vector<8x256xf32>
      %c0_27 = arith.constant 0 : index
      %c0_28 = arith.constant 0 : index
      %32 = vector.load %arg7[%c0_27, %c0_28] : memref<8x256xf32, #tpu.memory_space<vmem>>, vector<8x256xf32>
      tpu.vector_store %arg7[%c0_27, %c0_28], %31 {strides = array<i32>} : memref<8x256xf32, #tpu.memory_space<vmem>>, vector<8x256xf32>,
      %c0_29 = arith.constant 0 : index
      %c0_30 = arith.constant 0 : index
      %33 = vector.load %arg2[%c0_29, %c0_30] : memref<8x256xf32, #tpu.memory_space<vmem>>, vector<8x256xf32>
      %34 = arith.subf %31, %33 : vector<8x256xf32>
      %35 = arith.mulf %34, %34 : vector<8x256xf32>
      %cst_31 = arith.constant dense<0.000000e+00> : vector<8xf32>
      %36 = vector.multi_reduction <add>, %35, %cst_31 [1] : vector<8x256xf32> to vector<8xf32>
      %37 = vector.shape_cast %36 : vector<8xf32> to vector<8x1xf32>
      %38 = vector.shape_cast %37 : vector<8x1xf32> to vector<8x1xf32>
      %39 = vector.broadcast %38 : vector<8x1xf32> to vector<8x128xf32>
      %c0_32 = arith.constant 0 : index
      %c0_33 = arith.constant 0 : index
      %40 = vector.load %arg9[%c0_32, %c0_33] : memref<8x128xf32, #tpu.memory_space<vmem>>, vector<8x128xf32>
      tpu.vector_store %arg9[%c0_32, %c0_33], %39 {strides = array<i32>} : memref<8x128xf32, #tpu.memory_space<vmem>>, vector<8x128xf32>,
      %c0_34 = arith.constant 0 : index
      %c0_35 = arith.constant 0 : index
      %41 = vector.load %arg11[%c0_34, %c0_35] : memref<8x1xf32, #tpu.memory_space<vmem>>, vector<8x1xf32>
      %42 = vector.shape_cast %41 : vector<8x1xf32> to vector<8x1xf32>
      %43 = vector.broadcast %42 : vector<8x1xf32> to vector<8x128xf32>
      %c0_36 = arith.constant 0 : index
      %c0_37 = arith.constant 0 : index
      %44 = vector.load %arg10[%c0_36, %c0_37] : memref<8x128xf32, #tpu.memory_space<vmem>>, vector<8x128xf32>
      tpu.vector_store %arg10[%c0_36, %c0_37], %43 {strides = array<i32>} : memref<8x128xf32, #tpu.memory_space<vmem>>, vector<8x128xf32>,
    } else {
    }
    return
  }
  func.func @transform_0(%arg0: i32, %arg1: i32) -> (i32, i32) {
    %c0_i32 = arith.constant 0 : i32
    %c0_i32_0 = arith.constant 0 : i32
    return %arg0, %c0_i32 : i32, i32
  }
  func.func @transform_1(%arg0: i32, %arg1: i32) -> (i32, i32) {
    %c0_i32 = arith.constant 0 : i32
    %c0_i32_0 = arith.constant 0 : i32
    return %c0_i32, %arg1 : i32, i32
  }
  func.func @transform_2(%arg0: i32, %arg1: i32) -> (i32, i32) {
    %c0_i32 = arith.constant 0 : i32
    %c0_i32_0 = arith.constant 0 : i32
    return %arg1, %c0_i32 : i32, i32
  }
  func.func @transform_3(%arg0: i32, %arg1: i32) -> (i32, i32) {
    %c0_i32 = arith.constant 0 : i32
    %c0_i32_0 = arith.constant 0 : i32
    return %c0_i32, %arg1 : i32, i32
  }
  func.func @transform_4(%arg0: i32, %arg1: i32) -> (i32, i32) {
    %c0_i32 = arith.constant 0 : i32
    %c0_i32_0 = arith.constant 0 : i32
    %c0_i32_1 = arith.constant 0 : i32
    return %c0_i32, %c0_i32_0 : i32, i32
  }
  func.func @transform_5(%arg0: i32, %arg1: i32) -> (i32, i32) {
    %c0_i32 = arith.constant 0 : i32
    %c0_i32_0 = arith.constant 0 : i32
    return %arg0, %c0_i32 : i32, i32
  }
  func.func @transform_6(%arg0: i32, %arg1: i32) -> (i32, i32) {
    %c0_i32 = arith.constant 0 : i32
    return %arg0, %arg1 : i32, i32
  }
  func.func @transform_7(%arg0: i32, %arg1: i32) -> (i32, i32) {
    %c0_i32 = arith.constant 0 : i32
    %c0_i32_0 = arith.constant 0 : i32
    return %arg0, %c0_i32 : i32, i32
  }
  func.func @transform_8(%arg0: i32, %arg1: i32) -> (i32, i32) {
    %c0_i32 = arith.constant 0 : i32
    %c0_i32_0 = arith.constant 0 : i32
    return %arg0, %c0_i32 : i32, i32
  }
}

</mosaic_0001>

<bundles_post_ra>
// kernel: tpu_custom_call.1
= control target key start
LH: loop header
LB: loop body
LE: loop exit
PB: predicated region body
PF: predicated region fallthrough
CT: control target
= control target key end

     0   :  { %s2150_s0 = inlined_call_operand.hbm [shape: f32[24,256], index: 0, kind: input, shape index: {}]   ;;  %s2151_s1 = inlined_call_operand.hbm [shape: f32[256,384], index: 1, kind: input, shape index: {}]   ;;  %s2152_s2 = inlined_call_operand.hbm [shape: f32[384,256], index: 2, kind: input, shape index: {}]   ;;  %s2153_s3 = inlined_call_operand.hbm [shape: f32[2,384], index: 3, kind: input, shape index: {}]   ;;  %s2154_s4 = inlined_call_operand.vmem [shape: f32[1,256], index: 4, kind: input, shape index: {}]   ;;  %s2155_s5 = inlined_call_operand.hbm [shape: f32[24,256], index: 5, kind: output, shape index: {0}]   ;;  %s2156_s6 = inlined_call_operand.hbm [shape: f32[24,384], index: 6, kind: output, shape index: {1}]   ;;  %s2157_s7 = inlined_call_operand.hbm [shape: f32[24,128], index: 7, kind: output, shape index: {2}]   ;;  %s2158_s8 = inlined_call_operand.hbm [shape: f32[24,128], index: 8, kind: output, shape index: {3}]  }
   0x1   :  { %2182 = sst [smem:[#allocation41_spill]] %s2150_s0 }
   0x2   :  { %2183 = sst [smem:[#allocation42_spill]] %s2151_s1 }
   0x3   :  { %2184 = sst [smem:[#allocation43_spill]] %s2154_s4 }
   0x4   :  { %2185 = sst [smem:[#allocation44_spill]] %s2155_s5 }
   0x5   :  { %2186 = sst [smem:[#allocation45_spill]] %s2156_s6 }
   0x6   :  { %2187 = sst [smem:[#allocation46_spill]] %s2157_s7 }
   0x7   :  { %2188 = sst [smem:[#allocation47_spill]] %s2158_s8 }
   0x8   :  { %14 = vsyncpa [#allocation4], 0 }
   0x9   :  { %16 = vsyncpa [#allocation4 + $0x1], 0 }
   0xa   :  { %17 = vsyncpa [#allocation7], 0 }
   0xb   :  { %19 = vsyncpa [#allocation7 + $0x1], 0 }
   0xc   :  { %20 = vsyncpa [#allocation10], 0 }
   0xd   :  { %22 = vsyncpa [#allocation10 + $0x1], 0 }
   0xe   :  { %23 = vsyncpa [#allocation5], 0 }
   0xf   :  { %25 = vsyncpa [#allocation5 + $0x1], 0 }
  0x10   :  { %26 = vsyncpa [#allocation13], 0 }
  0x11   :  { %28 = vsyncpa [#allocation13 + $0x1], 0 }
  0x12   :  { %29 = vsyncpa [#allocation16], 0 }
  0x13   :  { %31 = vsyncpa [#allocation16 + $0x1], 0  ;;  %s1646_s27 = smov 0   ;;  %s1648_s28 = smov 0  }
  0x14   :  { %s1650_s29 = smov 0   ;;  %s1652_s30 = smov 0  }
  0x15   :  { %s1654_s9 = smov 0   ;;  %s1656_s10 = smov 0  }
  0x16   :  { %s1658_s11 = smov 0   ;;  %s1660_s12 = smov 0  }
  0x17   :  { %s1662_s13 = smov 0   ;;  %s1664_s14 = smov 0  }
  0x18   :  { %s1666_s15 = smov 0   ;;  %s1668_s16 = smov 0  }
  0x19   :  { %s1670_s17 = smov 0   ;;  %s1672_s18 = smov 0  }
  0x1a LB: > { %2189 = sst [smem:[#allocation24_spill]] %s1548_s29  ;;  %p64_p0 = scmp.eq.s32.totalorder %s1592_s18, 0  ;;  %s1592_s18 = sphi %s1672_s18, %s37_s18   ;;  %s1588_s17 = sphi %s1670_s17, %s2249_s17   ;;  %s1584_s16 = sphi %s1668_s16, %s2256_s16   ;;  %s1580_s15 = sphi %s1666_s15, %s2247_s15   ;;  %s1576_s14 = sphi %s1664_s14, %s2255_s14   ;;  %s1572_s13 = sphi %s1662_s13, %s2246_s13   ;;  %s1568_s12 = sphi %s1660_s12, %s2254_s12   ;;  %s1564_s11 = sphi %s1658_s11, %s2253_s11   ;;  %s1560_s10 = sphi %s1656_s10, %s2244_s10   ;;  %s1556_s9 = sphi %s1654_s9, %s2243_s9   ;;  %s1552_s30 = sphi %s1652_s30, %s2242_s30   ;;  %s1548_s29 = sphi %s1650_s29, %s2241_s29   ;;  %s1544_s28 = sphi %s1648_s28, %s2252_s28   ;;  %s1540_s27 = sphi %s1646_s27, %s2251_s27  }
  0x1b   : > { %2190 = sst [smem:[#allocation25_spill]] %s1556_s9  ;;  %p89_p1 = scmp.ne.s32.totalorder %s1560_s10, %s1556_s9 }
  0x1c   : > { %2191 = sst [smem:[#allocation26_spill]] %s1560_s10  ;;  %p2166_p2 = scmp.lt.s32.totalorder %s1592_s18, 9 }
  0x1d   : > { %2192 = sst [smem:[#allocation27_spill]] %s1564_s11  ;;  %p91_p3 = por %p89_p1, %p64_p0 }
  0x1e   : > { %2193 = sst [smem:[#allocation28_spill]] %s1572_s13  ;;  %s321_s19 = sand.u32 1, %s1592_s18  }
  0x1f   : > { %2194 = sst [smem:[#allocation29_spill]] %s1576_s14  ;;  %s1724_s20 = sand.u32 1, %s1560_s10  }
  0x20   : > { %2195 = sst [smem:[#allocation30_spill]] %s1580_s15  ;;  %s2162_s21 = sshll.u32 %s1724_s20, 8 }
  0x21   : > { %2196 = sst [smem:[#allocation31_spill]] %s1588_s17  ;;  %s1022_s22 = sshll.u32 %s1584_s16, 3 }
  0x22   : > { %2197 = sst [smem:[#allocation32_spill]] %s1592_s18  ;;  %s325_s8 = scalar_lea.vmem [#allocation6], %s2162_s21 }
  0x23   : > { %s2198_s1 = sld [smem:[#allocation42_spill]]  ;;  %s332_s7 = sshll.u32 %s325_s8, 4  ;;  %s333_s7 = int_to_ptr.vmem [resolvable:$true] %s332_s7 }
  0x24   : > { %p1735_p4 = pnand %p2166_p2, %p91_p3  ;;  %p1029_p5 = scmp.ge.s32.totalorder %s1592_s18, 1 }
  0x25   : > { %s1594_s23 = smov 384   ;;  %s1595_s8 = smov 128  }
  0x26   : > { %s1596_s24 = smov 8   ;;  %p382_p6 = scmp.lt.s32.totalorder %s1592_s18, 10 }
  0x27   : > { %s49_s6 = sadd.s32 1, %s1588_s17  ;;  %p63_p9 = scmp.ne.s32.totalorder %s1572_s13, %s1568_s12 }
  0x28   : > { %p1746_p7 = pnand %p1029_p5, %p382_p6  ;;  %p69_p10 = scmp.ne.s32.totalorder %s1568_s12, %s1564_s11 }
  0x29   : > { %s329_s25 = scalar_lea.hbm %s2198_s1, %s1022_s22  ;;  %s1740_s22 = scalar_lea.sflag [#allocation7], %s321_s19 }
  0x2a   : > { %s330_s26 = sshll.u32 %s329_s25, 4  ;;  %s1751_s19 = sadd.s32 4294967295, %s1592_s18   ;;  %s331_s26 = int_to_ptr.hbm [resolvable:$true] %s330_s26 }
  0x2b   : > { %1078 = dma.hbm_to_vmem [thread:$0]  (!%p1735_p4), %s331_s26, 4096, %s333_s7, %s1740_s22, %s1594_s23, %s1595_s8, %s1596_s24  }
  0x2c   : > { %s46_s1 = sadd.s32 1, %s1584_s16  ;;  %s56_s7 = sadd.s32 1, %s1572_s13 }
  0x2d   : > { %p47_p8 = scmp.ge.s32.totalorder %s46_s1, 3  ;;  %p1769_p11 = por %p64_p0, %p63_p9 }
  0x2e   : > { %p70_p12 = scmp.eq.s32.totalorder %s1751_s19, 0  ;;  %s82_s24 = sadd.s32 1, %s1560_s10 }
  0x2f   : > { %s2258_s1 = smov (%p47_p8, %s46_s1), 0  ;;  %s2260_s6 = smov (!%p47_p8, %s49_s6), %s1588_s17 }
  0x30   : > { %2201 = sst [smem:[#allocation33_spill]] %s2258_s1  ;;  %p51_p13 = scmp.ge.s32.totalorder %s2260_s6, 3 }
  0x31   : > { %s79_s23 = ssub.s32 %s1584_s16, %s2258_s1  ;;  %p1779_p1 = por %p70_p12, %p69_p10 }
  0x32   : > { %p80_p3 = scmp.eq.s32.totalorder %s79_s23, 0  ;;  %s2262_s6 = smov (%p51_p13, %s2260_s6), 0 }
  0x33   : > { %s2203_s8 = scalar_select %p1779_p1, 1, 0 }
  0x34   : > { %2205 = sst [smem:[#allocation35_spill]] %s2262_s6  ;;  %p95_p0 = scmp.ne.s32.totalorder %s1556_s9, %s1552_s30 }
  0x35   : > { %2204 = sst [smem:[#allocation34_spill]] %s2203_s8  ;;  %s53_s21 = ssub.s32 %s1588_s17, %s2262_s6 }
  0x36   : > { %p192_p5 = scmp.eq.s32.totalorder %s1751_s19, 8  ;;  %p54_p6 = scmp.eq.s32.totalorder %s53_s21, 0 }
  0x37   : > { %p1791_p8 = por %p95_p0, %p70_p12  ;;  %s2210_s30 = sadd.s32 4294967294, %s1592_s18  }
  0x38   : > { %s1796_s15 = scalar_select %p80_p3, %s1560_s10, %s82_s24  }
  0x39   : > { %s1799_s4 = scalar_select %p54_p6, %s1572_s13, %s56_s7  }
  0x3a   : > { %2207 = sst [smem:[#allocation36_spill]] %s1796_s15  ;;  %p1806_p13 = por %p192_p5, %p63_p9 }
  0x3b   : > { %2208 = sst [smem:[#allocation37_spill]] %s1799_s4  ;;  %p198_p2 = scmp.eq.s32.totalorder %s2210_s30, 8 }
  0x3c   : > { %s206_s6 = sor.u32 %s79_s23, %s53_s21  ;;  %s209_s9 = sadd.s32 1, %s1548_s29 }
  0x3d   : > { %p1816_p1 = por %p198_p2, %p69_p10  ;;  %p207_p12 = scmp.eq.s32.totalorder %s206_s6, 0 }
  0x3e   : > { %p219_p3 = scmp.ne.s32.totalorder %s1548_s29, %s1544_s28  ;;  %p225_p0 = scmp.ne.s32.totalorder %s1544_s28, %s1540_s27 }
  0x3f   : > { %s2211_s8 = scalar_select %p1816_p1, 1, 0 }
  0x40   : > { %s1825_s7 = scalar_select %p207_p12, %s1548_s29, %s209_s9  }
  0x41   : > { %2212 = sst [smem:[#allocation38_spill]] %s2211_s8  ;;  %p1829_p9 = por %p219_p3, %p192_p5 }
  0x42   : > { %2213 = sst [smem:[#allocation39_spill]] %s1825_s7  ;;  %p1833_p6 = por %p225_p0, %p198_p2 }
  0x43   : > { %s301_s23 = sand.u32 1, %s1572_s13   ;;  %s1051_s30 = sshll.u32 %s1588_s17, 4 }
  0x44   : > { %s2215_s21 = scalar_select %p1833_p6, 1, 0 }
  0x45   : > { %s1018_s4 = sshll.u32 %s301_s23, 4  ;;  %s2217_s0 = sld [smem:[#allocation41_spill]] }
  0x46   : > { %2216 = sst [smem:[#allocation40_spill]] %s2215_s21  ;;  %s305_s27 = scalar_lea.vmem [#allocation3], %s1018_s4 }
  0x47   : > { %s314_s9 = sshll.u32 %s305_s27, 4  ;;  %p2218_p2 = scmp.lt.s32.totalorder %s1592_s18, 9  ;;  %s315_s9 = int_to_ptr.vmem [resolvable:$true] %s314_s9 }
  0x48   : > { %s1053_s7 = sshll.u32 %s1584_s16, 8  ;;  %s2219_s13 = sshll.u32 %s1724_s20, 8 }
  0x49   : > { %p1073_p10 = pnand %p2218_p2, %p1769_p11  ;;  %s346_s17 = scalar_lea.vmem [#allocation8], %s2219_s13 }
  0x4a   : > { %s355_s29 = sshll.u32 %s346_s17, 4  ;;  %s352_s15 = scalar_lea.hbm %s2152_s2, %s1053_s7  ;;  %s356_s29 = int_to_ptr.vmem [resolvable:$true] %s355_s29 }
  0x4b   : > { %s310_s10 = scalar_lea.hbm %s2217_s0, %s1051_s30  ;;  %s353_s4 = sshll.u32 %s352_s15, 4  ;;  %s354_s4 = int_to_ptr.hbm [resolvable:$true] %s353_s4 }
  0x4c   : > { %s312_s8 = sshll.u32 %s310_s10, 4  ;;  %s302_s10 = scalar_lea.sflag [#allocation4], %s301_s23  ;;  %s313_s8 = int_to_ptr.hbm [resolvable:$true] %s312_s8 }
  0x4d   : > { %1075 = dma.hbm_to_vmem [thread:$0]  (!%p1073_p10), %s313_s8, 256, %s315_s9, %s302_s10  }
  0x4e   : > { %s1597_s30 = smov 256   ;;  %s1598_s6 = smov 16  }
  0x4f   : > { %1081 = dma.hbm_to_vmem [thread:$0]  (!%p1735_p4), %s354_s4, 4096, %s356_s29, %s1740_s22, %s1597_s30, %s1597_s30, %s1598_s6  }
  0x50   : > { %s1027_s26 = sshll.u32 %s1724_s20, 1  ;;  %s1028_s27 = sshll.u32 %s1584_s16, 1 }
  0x51   : > { %s373_s17 = scalar_lea.hbm %s2153_s3, %s1028_s27  ;;  %s369_s11 = scalar_lea.vmem [#allocation9], %s1027_s26 }
  0x52   : > { %s375_s18 = sshll.u32 %s373_s17, 4  ;;  %s377_s7 = sshll.u32 %s369_s11, 4  ;;  %s376_s18 = int_to_ptr.hbm [resolvable:$true] %s375_s18  ;;  %s378_s7 = int_to_ptr.vmem [resolvable:$true] %s377_s7 }
  0x53   : > { %s366_s8 = scalar_lea.sflag [#allocation10], %s1724_s20  ;;  %386 = sbr.rel (%p1746_p7) target bundleno = 638 (0x27e), region = 40 }
  0x54   : > { %1084 = dma.hbm_to_vmem [thread:$0]  (!%p1735_p4), %s376_s18, 32, %s378_s7, %s366_s8  }
  0x55   : > { %s2220_s21 = sld [smem:[#allocation34_spill]] (!%p1746_p7)  ;;  %s1866_s29 = sand.u32 (!%p1746_p7), 1, %s1568_s12  }
  0x56   : > { %s1030_s0 = sshll.u32 (!%p1746_p7), %s1866_s29, 4  ;;  %s389_s22 = scalar_lea.sflag (!%p1746_p7), [#allocation4], %s1866_s29 }
  0x57   : > { %s1872_s23 = scalar_lea.vmem (!%p1746_p7), [#allocation3], %s1030_s0 }
  0x5b   : > { %p2221_p11 = scmp.ne.s32.totalorder %s2220_s21, 0 }
  0x5d   : > { %1511 = dma.done.wait (%p2221_p11), %s389_s22, 256  }
  0x5e   : > { %1513 = vsyncadd (%p2221_p11), %s389_s22, 4294967040  ;;  %s2222_s5 = sld [smem:[#allocation25_spill]]  ;;  %s2181_s18 = sand.u32 1, %s1751_s19  }
  0x5f   : > { %s399_s9 = scalar_lea.sflag [#allocation7], %s2181_s18 }
  0x64   : > { %s400_s20 = sand.u32 1, %s2222_s5  }
  0x65   : > { %s1031_s25 = sshll.u32 %s400_s20, 8 }
  0x66   : > { %s1882_s15 = scalar_lea.vmem [#allocation6], %s1031_s25 }
  0x67   : > { %1515 = dma.done.wait (%p1791_p8), %s399_s9, 8192  }
  0x68   : > { %1517 = vsyncadd (%p1791_p8), %s399_s9, 4294959104  ;;  %s1033_s10 = sshll.u32 %s400_s20, 1  ;;  %s1888_s4 = scalar_lea.vmem [#allocation8], %s1031_s25 }
  0x69   : > { %s419_s30 = scalar_lea.sflag [#allocation10], %s400_s20  ;;  %s1890_s6 = scalar_lea.vmem [#allocation9], %s1033_s10 }
  0x6a   : > { %1519 = dma.done.wait (%p1791_p8), %s419_s30, 32  }
  0x6b   : > { %1521 = vsyncadd (%p1791_p8), %s419_s30, 4294967264  ;;  %s1036_s26 = sshll.u32 %s1866_s29, 3  ;;  %v506_v0 = vld [vmem:[%s1882_s15 + $0x78] sm:$0xff]  ;;  %v505_v1 = vld [vmem:[%s1882_s15 + $0x70] sm:$0xff]  ;;  %s469_s1 = sand.u32 1, %s1544_s28  }
  0x6c   : > { %v522_v2 = vld [vmem:[%s1882_s15 + $0xf8] sm:$0xff]  ;;  %524 = vmatpush.msra.mxu0 %v506_v0  ;;  %v521_v3 = vld [vmem:[%s1882_s15 + $0xf0] sm:$0xff]  ;;  %v504_v4 = vld [vmem:[%s1882_s15 + $0x68] sm:$0xff]  ;;  %s1965_s27 = sshll.u32 %s469_s1, 3  ;;  %s1973_s17 = scalar_lea.vmem [#allocation11], %s1030_s0 }
  0x6d   : > { %544 = vmatpush.msra.mxu1 %v522_v2  ;;  %v520_v5 = vld [vmem:[%s1882_s15 + $0xe8] sm:$0xff]  ;;  %v503_v6 = vld [vmem:[%s1882_s15 + $0x60] sm:$0xff]  ;;  %v502_v8 = vld [vmem:[%s1882_s15 + $0x58] sm:$0xff]  ;;  %s471_s13 = scalar_lea.vmem [#allocation12], %s1965_s27  ;;  %s1977_s11 = scalar_lea.vmem [#allocation14], %s1036_s26 }
  0x6e   : > { %525 = vmatpush.msra.mxu0 %v505_v1  ;;  %v519_v7 = vld [vmem:[%s1882_s15 + $0xe0] sm:$0xff]  ;;  %v518_v9 = vld [vmem:[%s1882_s15 + $0xd8] sm:$0xff]  ;;  %v501_v10 = vld [vmem:[%s1882_s15 + $0x50] sm:$0xff]  ;;  %s1981_s7 = scalar_lea.vmem [#allocation15], %s1036_s26  ;;  %s2223_s8 = sld [smem:[#allocation29_spill]] }
  0x6f   : > { %545 = vmatpush.msra.mxu1 %v521_v3  ;;  %v517_v11 = vld [vmem:[%s1882_s15 + $0xd0] sm:$0xff]  ;;  %v500_v12 = vld [vmem:[%s1882_s15 + $0x48] sm:$0xff]  ;;  %v499_v14 = vld [vmem:[%s1882_s15 + $0x40] sm:$0xff] }
  0x70   : > { %526 = vmatpush.msra.mxu0 %v504_v4  ;;  %v516_v13 = vld [vmem:[%s1882_s15 + $0xc8] sm:$0xff]  ;;  %v596_v15 = vld [vmem:[%s1888_s4 + $0xf0] sm:$0xff]  ;;  %v597_v16 = vld [vmem:[%s1888_s4 + $0xf8] sm:$0xff] }
  0x71   : > { %546 = vmatpush.msra.mxu1 %v520_v5  ;;  %v515_v17 = vld [vmem:[%s1882_s15 + $0xc0] sm:$0xff]  ;;  %598 = vmatpush.msra.mxu2 %v596_v15  ;;  %v595_v19 = vld [vmem:[%s1888_s4 + $0xe8] sm:$0xff]  ;;  %v592_v20 = vld [vmem:[%s1888_s4 + $0xd0] sm:$0xff] }
  0x72   : > { %527 = vmatpush.msra.mxu0 %v503_v6  ;;  %618 = vmatpush.msra.mxu3 %v597_v16  ;;  %v594_v18 = vld [vmem:[%s1888_s4 + $0xe0] sm:$0xff]  ;;  %v593_v21 = vld [vmem:[%s1888_s4 + $0xd8] sm:$0xff]  ;;  %v591_v25 = vld [vmem:[%s1888_s4 + $0xc8] sm:$0xff] }
  0x73   : > { %547 = vmatpush.msra.mxu1 %v519_v7  ;;  %v498_v22 = vld [vmem:[%s1882_s15 + $0x38] sm:$0xff]  ;;  %599 = vmatpush.msra.mxu2 %v594_v18  ;;  %v590_v24 = vld [vmem:[%s1888_s4 + $0xc0] sm:$0xff]  ;;  %v497_v26 = vld [vmem:[%s1882_s15 + $0x30] sm:$0xff] }
  0x74   : > { %528 = vmatpush.msra.mxu0 %v502_v8  ;;  %v514_v23 = vld [vmem:[%s1882_s15 + $0xb8] sm:$0xff]  ;;  %619 = vmatpush.msra.mxu3 %v595_v19  ;;  %v513_v27 = vld [vmem:[%s1882_s15 + $0xb0] sm:$0xff]  ;;  %v496_v30 = vld [vmem:[%s1882_s15 + $0x28] sm:$0xff]  ;;  %p1038_p4 = scmp.ne.s32.totalorder %s2223_s8, 0 }
  0x75   : > { %548 = vmatpush.msra.mxu1 %v518_v9  ;;  %600 = vmatpush.msra.mxu2 %v592_v20  ;;  %v588_v28 = vld [vmem:[%s1888_s4 + $0xb0] sm:$0xff]  ;;  %v589_v29 = vld [vmem:[%s1888_s4 + $0xb8] sm:$0xff]  ;;  %v512_v31 = vld [vmem:[%s1882_s15 + $0xa8] sm:$0xff] }
  0x76   : > { %529 = vmatpush.msra.mxu0 %v501_v10  ;;  %620 = vmatpush.msra.mxu3 %v593_v21  ;;  %v586_v32 = vld [vmem:[%s1888_s4 + $0xa0] sm:$0xff]  ;;  %v587_v33 = vld [vmem:[%s1888_s4 + $0xa8] sm:$0xff]  ;;  %v584_v36 = vld [vmem:[%s1888_s4 + $0x90] sm:$0xff] }
  0x77   : > { %549 = vmatpush.msra.mxu1 %v517_v11  ;;  %601 = vmatpush.msra.mxu2 %v590_v24  ;;  %v495_v34 = vld [vmem:[%s1882_s15 + $0x20] sm:$0xff]  ;;  %v585_v37 = vld [vmem:[%s1888_s4 + $0x98] sm:$0xff]  ;;  %v583_v41 = vld [vmem:[%s1888_s4 + $0x88] sm:$0xff] }
  0x78   : > { %530 = vmatpush.msra.mxu0 %v500_v12  ;;  %621 = vmatpush.msra.mxu3 %v591_v25  ;;  %v511_v35 = vld [vmem:[%s1882_s15 + $0xa0] sm:$0xff]  ;;  %v494_v38 = vld [vmem:[%s1882_s15 + $0x18] sm:$0xff]  ;;  %v493_v42 = vld [vmem:[%s1882_s15 + $0x10] sm:$0xff] }
  0x79   : > { %550 = vmatpush.msra.mxu1 %v516_v13  ;;  %602 = vmatpush.msra.mxu2 %v588_v28  ;;  %v510_v39 = vld [vmem:[%s1882_s15 + $0x98] sm:$0xff]  ;;  %v582_v40 = vld [vmem:[%s1888_s4 + $0x80] sm:$0xff]  ;;  %v509_v43 = vld [vmem:[%s1882_s15 + $0x90] sm:$0xff] }
  0x7a   : > { %531 = vmatpush.msra.mxu0 %v499_v14  ;;  %622 = vmatpush.msra.mxu3 %v589_v29  ;;  %v580_v44 = vld [vmem:[%s1888_s4 + $0x70] sm:$0xff]  ;;  %v581_v45 = vld [vmem:[%s1888_s4 + $0x78] sm:$0xff]  ;;  %v492_v46 = vld [vmem:[%s1882_s15 + $0x8] sm:$0xff] }
  0x7b   : > { %551 = vmatpush.msra.mxu1 %v515_v17  ;;  %603 = vmatpush.msra.mxu2 %v586_v32  ;;  %v508_v47 = vld [vmem:[%s1882_s15 + $0x88] sm:$0xff]  ;;  %v578_v48 = vld [vmem:[%s1888_s4 + $0x60] sm:$0xff]  ;;  %v576_v54 = vld [vmem:[%s1888_s4 + $0x50] sm:$0xff] }
  0x7c   : > { %532 = vmatpush.msra.mxu0 %v498_v22  ;;  %623 = vmatpush.msra.mxu3 %v587_v33  ;;  %v579_v49 = vld [vmem:[%s1888_s4 + $0x68] sm:$0xff]  ;;  %v491_v50 = vld [vmem:[%s1882_s15] sm:$0xff]  ;;  %v577_v55 = vld [vmem:[%s1888_s4 + $0x58] sm:$0xff] }
  0x7d   : > { %552 = vmatpush.msra.mxu1 %v514_v23  ;;  %604 = vmatpush.msra.mxu2 %v584_v36  ;;  %v507_v51 = vld [vmem:[%s1882_s15 + $0x80] sm:$0xff]  ;;  %v488_v53 = vld [vmem:[%s1872_s23 + $0x8] sm:$0xff]  ;;  %v572_v58 = vld [vmem:[%s1888_s4 + $0x30] sm:$0xff] }
  0x7e   : > { %533 = vmatpush.msra.mxu0 %v497_v26  ;;  %624 = vmatpush.msra.mxu3 %v585_v37  ;;  %v487_v52 = vld [vmem:[%s1872_s23] sm:$0xff]  ;;  %v575_v57 = vld [vmem:[%s1888_s4 + $0x48] sm:$0xff]  ;;  %v573_v59 = vld [vmem:[%s1888_s4 + $0x38] sm:$0xff] }
  0x7f   : > { %553 = vmatpush.msra.mxu1 %v513_v27  ;;  %605 = vmatpush.msra.mxu2 %v582_v40  ;;  %v574_v56 = vld [vmem:[%s1888_s4 + $0x40] sm:$0xff]  ;;  %v571_v61 = vld [vmem:[%s1888_s4 + $0x28] sm:$0xff]  ;;  %v568_v62 = vld [vmem:[%s1888_s4 + $0x10] sm:$0xff] }
  0x80   : > { %534 = vmatpush.msra.mxu0 %v496_v30  ;;  %625 = vmatpush.msra.mxu3 %v583_v41  ;;  %v570_v60 = vld [vmem:[%s1888_s4 + $0x20] sm:$0xff]  ;;  %v569_v63 = vld [vmem:[%s1888_s4 + $0x18] sm:$0xff]  ;;  %v567_v1 = vld [vmem:[%s1888_s4 + $0x8] sm:$0xff] }
  0x81   : > { %554 = vmatpush.msra.mxu1 %v512_v31  ;;  %606 = vmatpush.msra.mxu2 %v580_v44  ;;  %v566_v0 = vld [vmem:[%s1888_s4] sm:$0xff] }
  0x82   : > { %535 = vmatpush.msra.mxu0 %v495_v34  ;;  %626 = vmatpush.msra.mxu3 %v581_v45  ;;  %v1219_v2 = vld [vmem:[%s1890_s6] ss:$0 sm:$0xff]  ;;  %v1220_v7 = vld [vmem:[%s1890_s6 + $0x1] ss:$0 sm:$0xff] }
  0x83   : > { %555 = vmatpush.msra.mxu1 %v511_v35  ;;  %607 = vmatpush.msra.mxu2 %v578_v48 }
  0x84   : > { %536 = vmatpush.msra.mxu0 %v494_v38  ;;  %627 = vmatpush.msra.mxu3 %v579_v49 }
  0x85   : > { %556 = vmatpush.msra.mxu1 %v510_v39  ;;  %608 = vmatpush.msra.mxu2 %v576_v54 }
  0x86   : > { %537 = vmatpush.msra.mxu0 %v493_v42  ;;  %628 = vmatpush.msra.mxu3 %v577_v55 }
  0x87   : > { %557 = vmatpush.msra.mxu1 %v509_v43  ;;  %609 = vmatpush.msra.mxu2 %v574_v56 }
  0x88   : > { %538 = vmatpush.msra.mxu0 %v492_v46  ;;  %629 = vmatpush.msra.mxu3 %v575_v57 }
  0x89   : > { %558 = vmatpush.msra.mxu1 %v508_v47  ;;  %610 = vmatpush.msra.mxu2 %v572_v58 }
  0x8a   : > { %539 = vmatpush.msra.mxu0 %v491_v50  ;;  %630 = vmatpush.msra.mxu3 %v573_v59 }
  0x8b   : > { %559 = vmatpush.msra.mxu1 %v507_v51  ;;  %540 = vmatmul.f32.vlgmr.msra.gmra.mxu0 %v487_v52 }
  0x8c   : > { %560 = vmatmul.f32.vlgmr.msra.gmra.mxu1 %v488_v53  ;;  %611 = vmatpush.msra.mxu2 %v570_v60 }
  0x8d   : > { %631 = vmatpush.msra.mxu3 %v571_v61 }
  0x8e   : > { %612 = vmatpush.msra.mxu2 %v568_v62 }
  0x8f   : > { %632 = vmatpush.msra.mxu3 %v569_v63 }
  0x90   : > { %613 = vmatpush.msra.mxu2 %v566_v0 }
  0x91   : > { %633 = vmatpush.msra.mxu3 %v567_v1 }
 0x108   : > { %v541_v3 = vpop.f32.mrf.mxu0 }
 0x109   : > { %v561_v4 = vpop.f32.mrf.mxu1  ;;  %v542_v5 = vadd.f32 %v1219_v2, %v541_v3 }
 0x10b   : > { %v562_v6 = vadd.f32 %v561_v4, %v542_v5 }
 0x10d   : > { %v564_v8 = vmax.f32 %v562_v6, 0.0 }
 0x10f   : > { %565 = vst [vmem:[%s471_s13] sm:$0xff] %v564_v8  ;;  %614 = vmatmul.f32.vlgmr.msra.gmra.mxu2 %v564_v8  ;;  %634 = vmatmul.f32.vlgmr.msra.gmra.mxu3 %v564_v8  ;;  %v639_v9 = vmul.f32 %v1220_v7, %v564_v8 }
 0x111   : > { %640 = vadd.xlane.f32.xlu0 %v639_v9 }
 0x184   : > { %v641_v10 = vpop.xlane.xlu0 %640 }
 0x18e   : > { %645 = sbr.rel (%p1038_p4) target bundleno = 407 (0x197), region = 60 }
 0x192   : > { %v615_v11 = vpop.f32.mrf.mxu2  ;;  %v635_v12 = vpop.f32.mrf.mxu3 }
 0x193   : > { %vm648_vm0 = vcmask 7168   ;;  %v1599_v13 = vmov 0.0  }
 0x194   : > { %646 = vst [vmem:[%s1973_s17] sm:$0xff] %v1599_v13 }
 0x195   : > { %647 = vst [vmem:[%s1973_s17 + $0x8] sm:$0xff] %v1599_v13 }
 0x196   : > { %649 = vst.msk [vmem:[#allocation2] sm:$0xff] %vm648_vm0, %v1599_v13 }
 0x197 PF: > { %vm658_vm1 = vcmask 7168   ;;  %s2224_s21 = sld [smem:[#allocation29_spill]] }
 0x19b   : > { %v650_v14 = vld [vmem:[%s1973_s17] sm:$0xff] }
 0x19c   : > { %v651_v15 = vld [vmem:[%s1973_s17 + $0x8] sm:$0xff]  ;;  %v652_v17 = vadd.f32 %v650_v14, %v615_v11 }
 0x19d   : > { %v656_v16 = vld [vmem:[#allocation2] sm:$0xff]  ;;  %v653_v18 = vadd.f32 %v651_v15, %v635_v12  ;;  %p1039_p7 = scmp.ne.s32.totalorder %s2224_s21, 2 }
 0x19e   : > { %v657_v19 = vadd.f32 %v656_v16, %v641_v10  ;;  %654 = vst [vmem:[%s1973_s17] sm:$0xff] %v652_v17  ;;  %s2225_s5 = sld [smem:[#allocation43_spill]] (!%p1039_p7) }
 0x19f   : > { %655 = vst [vmem:[%s1973_s17 + $0x8] sm:$0xff] %v653_v18  ;;  %663 = sbr.rel (%p1039_p7) target bundleno = 567 (0x237), region = 64 }
 0x1a0   : > { %659 = vst.msk [vmem:[#allocation2] sm:$0xff] %vm658_vm1, %v657_v19 }
 0x1a4   : > { %v666_v22 = vld [vmem:[%s2225_s5] sm:$0x3]  ;;  %v1600_v25 = vmov 0   ;;  %v676_v26 = vld [vmem:[%s1872_s23] sm:$0xff] }
 0x1a5   : > { %v664_v20 = vld [vmem:[%s1973_s17] sm:$0xff]  ;;  %v668_v23 = vperm.slane %v666_v22, 0  ;;  %v669_v24 = vperm.slane %v666_v22, 1  ;;  %1221 = vset.pattern.permute.xlu0 %v1600_v25 }
 0x1a6   : > { %v665_v21 = vld [vmem:[%s1973_s17 + $0x8] sm:$0xff] }
 0x1a7   : > { %v677_v27 = vld [vmem:[%s1872_s23 + $0x8] sm:$0xff]  ;;  %v672_v28 = vadd.f32 %v668_v23, %v664_v20  ;;  %v673_v29 = vadd.f32 %v669_v24, %v665_v21 }
 0x1a8   : > { %v686_v35 = vld [vmem:[#allocation2] sm:$0xff] }
 0x1a9   : > { %675 = vst [vmem:[%s1973_s17 + $0x8] sm:$0xff] %v673_v29  ;;  %v678_v30 = vsub.f32 %v672_v28, %v676_v26  ;;  %v679_v31 = vsub.f32 %v673_v29, %v677_v27 }
 0x1aa   : > { %674 = vst [vmem:[%s1973_s17] sm:$0xff] %v672_v28 }
 0x1ab   : > { %v680_v32 = vmul.f32 %v678_v30, %v678_v30  ;;  %v681_v33 = vmul.f32 %v679_v31, %v679_v31 }
 0x1ad   : > { %v682_v34 = vadd.f32 %v681_v33, %v680_v32 }
 0x1af   : > { %683 = vadd.xlane.f32.xlu0 %v682_v34 }
 0x1c3   : > { %689 = vperm.xlu0 %1221, %v686_v35  }
 0x222   : > { %v684_v36 = vpop.xlane.xlu0 %683 }
 0x223   : > { %685 = vst [vmem:[%s1977_s11] sm:$0xff] %v684_v36 }
 0x235   : > { %v690_v37 = vpop.permute.xlu0 %689 }
 0x236   : > { %692 = vst [vmem:[%s1981_s7] sm:$0xff] %v690_v37 }
 0x237 PF: > { %s2226_s20 = sld [smem:[#allocation30_spill]]  ;;  %s738_s9 = sshll.u32 %s471_s13, 4  ;;  %s739_s9 = int_to_ptr.vmem [resolvable:$true] %s738_s9 }
 0x238   : > { %s2227_s23 = sld [smem:[#allocation29_spill]]  ;;  %s722_s18 = sshll.u32 %s1973_s17, 4  ;;  %s2014_s18 = int_to_ptr.vmem [resolvable:$true] %s722_s18 }
 0x239   : > { %s2228_s26 = sld [smem:[#allocation45_spill]]  ;;  %s2230_s27 = sand.u32 1, %s1751_s19  }
 0x23a   : > { %s2229_s0 = sld [smem:[#allocation44_spill]]  ;;  %s2018_s13 = scalar_lea.sflag [#allocation13], %s2230_s27 }
 0x23d   : > { %s1055_s25 = smul.u32 3, %s2226_s20  ;;  %s1054_s4 = sshll.u32 %s2226_s20, 4 }
 0x23f   : > { %s734_s15 = sadd.s32 %s2227_s23, %s1055_s25  ;;  %s1362_s30 = scalar_lea.hbm %s2228_s26, 72 }
 0x240   : > { %s1046_s10 = sshll.u32 %s734_s15, 3  ;;  %s720_s22 = scalar_lea.hbm %s2229_s0, %s1054_s4 }
 0x241   : > { %s736_s1 = scalar_lea.hbm %s2228_s26, %s1046_s10 }
 0x242   : > { %s740_s5 = sshll.u32 %s736_s1, 4  ;;  %s741_s5 = int_to_ptr.hbm [resolvable:$true] %s740_s5 }
 0x243   : > { %s1356_s23 = sshra.s32 %s741_s5, 4  ;;  %s1357_s23 = int_to_ptr.hbm [resolvable:$true] %s1356_s23 }
 0x244   : > { %s1358_s25 = scalar_lea.hbm %s1357_s23, 8  ;;  %p1363_p3 = scmp.lt.s32.totalorder %s1357_s23, %s2228_s26 }
 0x245   : > { %p1359_p5 = scmp.ne.s32.totalorder %s1357_s23, %s1358_s25  ;;  %p1364_p0 = scmp.lt.s32.totalorder %s1362_s30, %s1358_s25 }
 0x247   : > { %p1360_p8 = pnand %p1359_p5, %p1829_p9  ;;  %p1365_p2 = por %p1364_p0, %p1363_p3 }
 0x249   : > { %p1361_p12 = pneg %p1360_p8 }
 0x24b   : > { %p1366_p10 = pnand %p1365_p2, %p1361_p12 }
 0x24d   : > { %1369 = shalt.err (!%p1366_p10)
}
 0x24e   : > { %1065 = dma.vmem_to_hbm [thread:$0]  (%p1829_p9), %s739_s9, 128, %s741_s5, %s2018_s13  }
 0x24f   : > { %s724_s19 = sshll.u32 %s720_s22, 4  ;;  %s1047_s17 = sshll.u32 %s2226_s20, 3  ;;  %s725_s19 = int_to_ptr.hbm [resolvable:$true] %s724_s19 }
 0x250   : > { %s2231_s21 = sld [smem:[#allocation46_spill]]  ;;  %s694_s23 = scalar_lea.sflag [#allocation5], %s1866_s29 }
 0x251   : > { %s1384_s25 = sshra.s32 %s725_s19, 4  ;;  %s1390_s9 = scalar_lea.hbm %s2229_s0, 48  ;;  %s1385_s25 = int_to_ptr.hbm [resolvable:$true] %s1384_s25 }
 0x252   : > { %s1386_s15 = scalar_lea.hbm %s1385_s25, 16  ;;  %p1391_p9 = scmp.lt.s32.totalorder %s1385_s25, %s2229_s0 }
 0x253   : > { %p1387_p11 = scmp.ne.s32.totalorder %s1385_s25, %s1386_s15  ;;  %p1392_p5 = scmp.lt.s32.totalorder %s1390_s9, %s1386_s15 }
 0x255   : > { %p1388_p4 = pnand %p1387_p11, %p1806_p13  ;;  %p1393_p8 = por %p1392_p5, %p1391_p9 }
 0x256   : > { %s750_s27 = scalar_lea.hbm %s2231_s21, %s1047_s17 }
 0x257   : > { %p1389_p7 = pneg %p1388_p4 }
 0x259   : > { %p1394_p12 = pnand %p1393_p8, %p1389_p7 }
 0x25b   : > { %1397 = shalt.err (!%p1394_p12)
}
 0x25c   : > { %1064 = dma.vmem_to_hbm [thread:$0]  (%p1806_p13), %s2014_s18, 256, %s725_s19, %s694_s23  }
 0x25d   : > { %s752_s30 = sshll.u32 %s1977_s11, 4  ;;  %s754_s4 = sshll.u32 %s750_s27, 4  ;;  %s753_s30 = int_to_ptr.vmem [resolvable:$true] %s752_s30  ;;  %s755_s4 = int_to_ptr.hbm [resolvable:$true] %s754_s4 }
 0x25e   : > { %s1412_s6 = sshra.s32 %s755_s4, 4  ;;  %s1418_s15 = scalar_lea.hbm %s2231_s21, 24  ;;  %s1413_s6 = int_to_ptr.hbm [resolvable:$true] %s1412_s6 }
 0x25f   : > { %s1414_s1 = scalar_lea.hbm %s1413_s6, 8  ;;  %p1419_p10 = scmp.lt.s32.totalorder %s1413_s6, %s2231_s21 }
 0x260   : > { %p1415_p3 = scmp.ne.s32.totalorder %s1413_s6, %s1414_s1  ;;  %p1420_p11 = scmp.lt.s32.totalorder %s1418_s15, %s1414_s1 }
 0x262   : > { %p1416_p0 = pnand %p1415_p3, %p1806_p13  ;;  %p1421_p4 = por %p1420_p11, %p1419_p10 }
 0x264   : > { %p1417_p2 = pneg %p1416_p0 }
 0x266   : > { %p1422_p7 = pnand %p1421_p4, %p1417_p2 }
 0x268   : > { %1425 = shalt.err (!%p1422_p7)
}
 0x269   : > { %1066 = dma.vmem_to_hbm [thread:$0]  (%p1806_p13), %s753_s30, 128, %s755_s4, %s2018_s13  }
 0x26a   : > { %s2232_s19 = sld [smem:[#allocation47_spill]]  ;;  %s766_s23 = sshll.u32 %s1981_s7, 4  ;;  %s767_s23 = int_to_ptr.vmem [resolvable:$true] %s766_s23 }
 0x26b   : > { %s709_s22 = scalar_lea.sflag [#allocation16], %s1866_s29 }
 0x270   : > { %s764_s27 = scalar_lea.hbm %s2232_s19, %s1047_s17  ;;  %s1446_s20 = scalar_lea.hbm %s2232_s19, 24 }
 0x271   : > { %s768_s9 = sshll.u32 %s764_s27, 4  ;;  %s769_s9 = int_to_ptr.hbm [resolvable:$true] %s768_s9 }
 0x272   : > { %s1440_s5 = sshra.s32 %s769_s9, 4  ;;  %s1441_s5 = int_to_ptr.hbm [resolvable:$true] %s1440_s5 }
 0x273   : > { %s1442_s6 = scalar_lea.hbm %s1441_s5, 8  ;;  %p1447_p12 = scmp.lt.s32.totalorder %s1441_s5, %s2232_s19 }
 0x274   : > { %p1443_p9 = scmp.ne.s32.totalorder %s1441_s5, %s1442_s6  ;;  %p1448_p3 = scmp.lt.s32.totalorder %s1446_s20, %s1442_s6 }
 0x276   : > { %p1444_p5 = pnand %p1443_p9, %p1806_p13  ;;  %p1449_p0 = por %p1448_p3, %p1447_p12 }
 0x278   : > { %p1445_p8 = pneg %p1444_p5 }
 0x27a   : > { %p1450_p2 = pnand %p1449_p0, %p1445_p8 }
 0x27c   : > { %1453 = shalt.err (!%p1450_p2)
}
 0x27d   : > { %1067 = dma.vmem_to_hbm [thread:$0]  (%p1806_p13), %s767_s23, 128, %s769_s9, %s709_s22  }
 0x27e PF: > { %s2233_s29 = sld [smem:[#allocation32_spill]] }
 0x27f   : > { %s2234_s7 = sld [smem:[#allocation27_spill]] }
 0x284   : > { %p1099_p10 = scmp.ge.s32.totalorder %s2233_s29, 2 }
 0x285   : > { %s780_s4 = sand.u32 1, %s2234_s7  }
 0x286   : > { %p1086_p11 = pnand %p1099_p10, %p1816_p1  ;;  %s781_s15 = scalar_lea.sflag [#allocation5], %s780_s4 }
 0x288   : > { %p2082_p4 = pneg %p1086_p11 }
 0x28a   : > { %1523 = dma.done.wait (%p2082_p4), %s781_s15, 256  }
 0x28b   : > { %1525 = vsyncadd (%p2082_p4), %s781_s15, 4294967040  ;;  %s2237_s14 = sadd.s32 4294967294, %s2233_s29   ;;  %p1089_p13 = pnand %p1099_p10, %p1833_p6 }
 0x28c   : > { %s790_s10 = sand.u32 1, %s2237_s14  }
 0x28d   : > { %p1090_p7 = pneg %p1089_p13  ;;  %s791_s18 = scalar_lea.sflag [#allocation13], %s790_s10 }
 0x28f   : > { %1527 = dma.done.wait (%p1090_p7), %s791_s18, 128  }
 0x290   : > { %1529 = vsyncadd (%p1090_p7), %s791_s18, 4294967168 }
 0x291   : > { %1531 = dma.done.wait (%p2082_p4), %s791_s18, 128  }
 0x292   : > { %1533 = vsyncadd (%p2082_p4), %s791_s18, 4294967168  ;;  %s811_s11 = scalar_lea.sflag [#allocation16], %s780_s4 }
 0x293   : > { %1535 = dma.done.wait (%p2082_p4), %s811_s11, 128  }
 0x294   : > { %1537 = vsyncadd (%p2082_p4), %s811_s11, 4294967168  ;;  %s37_s18 = sadd.s32 1, %s2233_s29   ;;  %s2240_s23 = sld [smem:[#allocation24_spill]] }
 0x295   : > { %p2103_p1 = scmp.ge.s32.totalorder %s37_s18, 11   ;;  %s2241_s29 = sld [smem:[#allocation39_spill]] }
 0x296   : > { %s2242_s30 = sld [smem:[#allocation25_spill]]  ;;  %s2251_s27 = smov %s1544_s28 }
 0x297   : > { %s2243_s9 = sld [smem:[#allocation26_spill]]  ;;  %s2253_s11 = smov %s1568_s12 }
 0x298   : > { %s2244_s10 = sld [smem:[#allocation36_spill]]  ;;  %s2255_s14 = smov %s1584_s16 }
 0x299   : > { %s2245_s22 = sld [smem:[#allocation28_spill]] }
 0x29a   : > { %s2246_s13 = sld [smem:[#allocation37_spill]]  ;;  %s2252_s28 = smov %s2240_s23 }
 0x29b   : > { %s2247_s15 = sld [smem:[#allocation31_spill]] }
 0x29c   : > { %s2248_s5 = sld [smem:[#allocation33_spill]] }
 0x29d   : > { %s2249_s17 = sld [smem:[#allocation35_spill]] }
 0x29e   :  { %36 = sbr.rel (!%p2103_p1) target bundleno = 26 (0x1a), region = 179 }
 0x29f   : > { %s2254_s12 = smov %s2245_s22 }
 0x2a2   : > { %s2256_s16 = smov %s2248_s5 }
 0x2a3   :  { %817 = vsyncpa [#allocation4], 1 }
 0x2a4   :  { %819 = vsyncpa [#allocation4 + $0x1], 1 }
 0x2a5   :  { %820 = vsyncpa [#allocation7], 1 }
 0x2a6   :  { %822 = vsyncpa [#allocation7 + $0x1], 1 }
 0x2a7   :  { %823 = vsyncpa [#allocation10], 1 }
 0x2a8   :  { %825 = vsyncpa [#allocation10 + $0x1], 1 }
 0x2a9   :  { %826 = vsyncpa [#allocation5], 1 }
 0x2aa   :  { %828 = vsyncpa [#allocation5 + $0x1], 1 }
 0x2ab   :  { %829 = vsyncpa [#allocation13], 1 }
 0x2ac   :  { %831 = vsyncpa [#allocation13 + $0x1], 1 }
 0x2ad   :  { %832 = vsyncpa [#allocation16], 1 }
 0x2ae   :  { %834 = vsyncpa [#allocation16 + $0x1], 1 }

</bundles_post_ra>
